<compile_context>
chip_gen: v5e
topology: v5e:2x2
jax: 0.10.0
libtpu: 0.0.40
codegen_flags: <defaults>
</compile_context>

<pallas_src>
import jax
import jax.numpy as jnp
import numpy as np
from jax.experimental import pallas as pl
from jax.experimental.pallas import tpu as pltpu


def _attention_kernel(dec_ref, enc_ref, params_ref, out_ref):
    # dec_ref    : (B, H)        decoder hidden (leading singleton squeezed)
    # enc_ref    : (B, S, 2H)    encoder outputs
    # params_ref : (3H+2, H)     packed [W1d_T (H,H) | W1e_T (2H,H) | b1 (1,H) | W2 (1,H)]
    # out_ref    : (B, 1, 2H+S)  packed [context | attention weights]
    B, S, E = enc_ref.shape
    H = E // 2

    # Static slices of the packed parameter block (one DMA for all params).
    w1d = params_ref[0:H, :]                     # (H, H)   attn_combine weight, dec part (transposed)
    w1e = params_ref[H:3 * H, :]                 # (2H, H)  attn_combine weight, enc part (transposed)
    b1 = params_ref[3 * H:3 * H + 1, :]          # (1, H)   attn_combine bias
    w2 = params_ref[3 * H + 1:3 * H + 2, :]      # (1, H)   score_layer weight (row form)

    enc = enc_ref[...]                           # (B, S, 2H)
    # S == 8 -> sublane-tile-aligned collapse, no relayout copy.
    enc_flat = enc.reshape(B * S, E)             # (B*S, 2H)

    # Split-weight trick: cat([dec, enc]) @ W1.T == dec @ W1d.T + enc @ W1e.T (exact).
    enc_proj = jnp.dot(enc_flat, w1e,
                       preferred_element_type=jnp.float32)        # (B*S, H)
    dec_proj = jnp.dot(dec_ref[...], w1d,
                       preferred_element_type=jnp.float32)        # (B, H)

    pre = (enc_proj.reshape(B, S, H)
           + dec_proj[:, None, :]
           + b1[None, :, :])                                      # (B, S, H)
    energy = jnp.tanh(pre)                                        # (B, S, H)

    # score_layer (Linear(H, 1, bias=False)): lane reduction -> (B, S)
    scores = jnp.sum(energy * w2[None, :, :], axis=-1)            # (B, S)

    # Softmax over S (PyTorch dim=1) — exact division (no approx reciprocal),
    # so attention rows sum to 1 to f32 accuracy.
    m = jnp.max(scores, axis=-1, keepdims=True)                   # (B, 1)
    p = jnp.exp(scores - m)                                       # (B, S)
    attn = p / jnp.sum(p, axis=-1, keepdims=True)                 # (B, S)

    # context = bmm(attn, enc): VPU broadcast-multiply + XLU sublane reduce
    # (avoids a second MXU drain on the serial tail on v5e/v6e).
    ctx = jnp.sum(attn[:, :, None] * enc, axis=1)                 # (B, 2H)

    # Single merged output slab: [ context | attention weights ].
    out_ref[:, :, 0:E] = ctx[:, None, :]                          # (B, 1, 2H)
    out_ref[:, :, E:E + S] = attn[:, None, :]                     # (B, 1, S)


def prepare_attention_params(W1, b1, W2):
    """One-time re-layout: pack all parameters into a single (3H+2, H) array.

    W1: (H, 3H) attn_combine weight, b1: (H,) its bias, W2: (1, H) score weight.
    Layout: rows [0,H)  = W1[:, :H].T   (decoder-hidden part)
            rows [H,3H) = W1[:, H:].T   (encoder part)
            row  3H     = b1
            row  3H+1   = W2
    """
    H = W1.shape[0]
    assert W1.shape[1] == 3 * H and W2.shape == (1, H)
    return jnp.concatenate(
        [jnp.transpose(W1[:, :H]),       # (H, H)
         jnp.transpose(W1[:, H:]),       # (2H, H)
         b1.reshape(1, H),               # (1, H)
         W2.reshape(1, H)],              # (1, H)
        axis=0).astype(jnp.float32)      # (3H+2, H)


@jax.jit
def attention_network(decoder_hidden, encoder_outputs, packed_params):
    """decoder_hidden: (1, B, H); encoder_outputs: (B, S, 2H);
    packed_params: (3H+2, H) from prepare_attention_params.
    Returns (context (B,1,2H), attention_weights (B,1,S))."""
    B, S, E = encoder_outputs.shape
    H = packed_params.shape[1]
    assert E == 2 * H and packed_params.shape[0] == 3 * H + 2

    dec = decoder_hidden[0]                      # (B, H) glue squeeze

    out = pl.pallas_call(
        _attention_kernel,
        out_shape=jax.ShapeDtypeStruct((B, 1, E + S), jnp.float32),
        grid_spec=pl.GridSpec(
            # Whole (tiny) problem in one step; per-step overhead paid once.
            # For production-sized B (esp. v7x, 2 TCs), split the batch over a
            # leading "parallel" grid axis instead.
            grid=(1,),
            in_specs=[
                pl.BlockSpec((B, H), lambda i: (0, 0)),                # dec
                pl.BlockSpec((B, S, E), lambda i: (0, 0, 0)),          # enc
                pl.BlockSpec((3 * H + 2, H), lambda i: (0, 0)),        # packed params
            ],
            out_specs=pl.BlockSpec((B, 1, E + S), lambda i: (0, 0, 0)),
        ),
        compiler_params=pltpu.CompilerParams(
            dimension_semantics=("parallel",)),
    )(dec, encoder_outputs, packed_params)

    ctx = out[:, :, :E]                          # (B, 1, 2H)
    attn = out[:, :, E:]                         # (B, 1, S)
    return ctx, attn


def _reference(decoder_hidden, encoder_outputs, W1, b1, W2):
    # pure-JAX replica of the PyTorch forward for verification
    B, S, E = encoder_outputs.shape
    dec = jnp.transpose(jnp.tile(decoder_hidden, (S, 1, 1)), (1, 0, 2))  # (B,S,H)
    combined = jnp.concatenate([dec, encoder_outputs], axis=2)           # (B,S,3H)
    energy = jnp.tanh(combined @ W1.T + b1)                              # (B,S,H)
    scores = (energy @ W2.T)[..., 0]                                     # (B,S)
    attn = jax.nn.softmax(scores, axis=1)[:, None, :]                    # (B,1,S)
    ctx = jnp.einsum('bos,bse->boe', attn, encoder_outputs)              # (B,1,2H)
    return ctx, attn


if __name__ == "__main__":
    B, S, H = 2, 8, 32
    key = jax.random.PRNGKey(0)
    k1, k2, k3, k4, k5 = jax.random.split(key, 5)

    # deterministic synthetic parameters (nn.Linear weight shapes)
    bound1 = 1.0 / np.sqrt(3 * H)
    bound2 = 1.0 / np.sqrt(H)
    W1 = jax.random.uniform(k1, (H, 3 * H), jnp.float32, -bound1, bound1)
    b1 = jax.random.uniform(k2, (H,), jnp.float32, -bound1, bound1)
    W2 = jax.random.uniform(k3, (1, H), jnp.float32, -bound2, bound2)

    # inputs
    decoder_hidden = jax.random.normal(k4, (1, B, H), jnp.float32)       # (1,B,H)
    encoder_outputs = jax.random.normal(k5, (B, S, 2 * H), jnp.float32)  # (B,S,2H)

    packed = prepare_attention_params(W1, b1, W2)   # one-time re-layout
    ctx, attn = attention_network(decoder_hidden, encoder_outputs, packed)
    ctx = jax.block_until_ready(ctx)
    attn = jax.block_until_ready(attn)

    ctx_ref, attn_ref = _reference(decoder_hidden, encoder_outputs, W1, b1, W2)
    assert ctx.shape == (B, 1, 2 * H) and attn.shape == (B, 1, S)

    # The softmax is exact (no approximate reciprocal); remaining small
    # differences stem from MXU default-precision f32 matmul decomposition
    # differing between the Mosaic kernel path and the XLA reference path
    # (observed max ~2e-3), so tolerances carry headroom over that.
    np.testing.assert_allclose(np.asarray(ctx), np.asarray(ctx_ref),
                               atol=5e-3, rtol=5e-3)
    np.testing.assert_allclose(np.asarray(attn), np.asarray(attn_ref),
                               atol=5e-3, rtol=5e-3)
    # attention weights are exactly normalized (to f32 accuracy) per batch row
    np.testing.assert_allclose(np.asarray(attn).sum(-1), np.ones((B, 1)),
                               atol=1e-5, rtol=0)

    print("KERNEL_OK")
</pallas_src>

<mosaic_0001>
module attributes {stable_mosaic.version = 11 : i64} {
  func.func @_attention_kernel(%arg0: i32, %arg1: memref<2x32xf32, #tpu.memory_space<vmem>>, %arg2: memref<2x8x64xf32, #tpu.memory_space<vmem>>, %arg3: memref<98x32xf32, #tpu.memory_space<vmem>>, %arg4: memref<2x1x72xf32, #tpu.memory_space<vmem>>) attributes {dimension_semantics = [#tpu.dimension_semantics<parallel>], iteration_bounds = array<i64: 1>, scalar_prefetch = 0 : i64, scratch_operands = 0 : i64, tpu.core_type = #tpu.core_type<tc>, window_params = [{pipeline_mode = #tpu.pipeline_mode<synchronous>, transform_indices = @transform_0, window_bounds = array<i64: 2, 32>}, {pipeline_mode = #tpu.pipeline_mode<synchronous>, transform_indices = @transform_1, window_bounds = array<i64: 2, 8, 64>}, {pipeline_mode = #tpu.pipeline_mode<synchronous>, transform_indices = @transform_2, window_bounds = array<i64: 98, 32>}, {pipeline_mode = #tpu.pipeline_mode<synchronous>, transform_indices = @transform_3, window_bounds = array<i64: 2, 1, 72>}]} {
    %c0 = arith.constant 0 : index
    %c0_0 = arith.constant 0 : index
    %0 = vector.load %arg3[%c0, %c0_0] : memref<98x32xf32, #tpu.memory_space<vmem>>, vector<32x32xf32>
    %c32 = arith.constant 32 : index
    %c0_1 = arith.constant 0 : index
    %1 = vector.load %arg3[%c32, %c0_1] : memref<98x32xf32, #tpu.memory_space<vmem>>, vector<64x32xf32>
    %c96 = arith.constant 96 : index
    %c0_2 = arith.constant 0 : index
    %2 = vector.load %arg3[%c96, %c0_2] : memref<98x32xf32, #tpu.memory_space<vmem>>, vector<1x32xf32>
    %c97 = arith.constant 97 : index
    %c0_3 = arith.constant 0 : index
    %3 = vector.load %arg3[%c97, %c0_3] : memref<98x32xf32, #tpu.memory_space<vmem>>, vector<1x32xf32>
    %c0_4 = arith.constant 0 : index
    %c0_5 = arith.constant 0 : index
    %c0_6 = arith.constant 0 : index
    %4 = vector.load %arg2[%c0_4, %c0_5, %c0_6] : memref<2x8x64xf32, #tpu.memory_space<vmem>>, vector<2x8x64xf32>
    %5 = vector.shape_cast %4 : vector<2x8x64xf32> to vector<16x64xf32>
    %cst = arith.constant dense<0.000000e+00> : vector<16x32xf32>
    %6 = tpu.matmul %5, %1, %cst {dimension_numbers = #tpu.dot_dimension_numbers<[1], [0], [0], [1], [0, 0, 1, 1], [], []>} : vector<16x64xf32>, vector<64x32xf32>, vector<16x32xf32> -> vector<16x32xf32>
    %c0_7 = arith.constant 0 : index
    %c0_8 = arith.constant 0 : index
    %7 = vector.load %arg1[%c0_7, %c0_8] : memref<2x32xf32, #tpu.memory_space<vmem>>, vector<2x32xf32>
    %cst_9 = arith.constant dense<0.000000e+00> : vector<2x32xf32>
    %8 = tpu.matmul %7, %0, %cst_9 {dimension_numbers = #tpu.dot_dimension_numbers<[1], [0], [0], [1], [0, 0, 1, 1], [], []>} : vector<2x32xf32>, vector<32x32xf32>, vector<2x32xf32> -> vector<2x32xf32>
    %9 = vector.shape_cast %6 : vector<16x32xf32> to vector<2x8x32xf32>
    %10 = vector.shape_cast %8 : vector<2x32xf32> to vector<2x1x32xf32>
    %11 = vector.broadcast %10 : vector<2x1x32xf32> to vector<2x8x32xf32>
    %12 = arith.addf %9, %11 : vector<2x8x32xf32>
    %13 = vector.shape_cast %2 : vector<1x32xf32> to vector<1x1x32xf32>
    %14 = vector.broadcast %13 : vector<1x1x32xf32> to vector<2x8x32xf32>
    %15 = arith.addf %12, %14 : vector<2x8x32xf32>
    %16 = math.tanh %15 : vector<2x8x32xf32>
    %17 = vector.shape_cast %3 : vector<1x32xf32> to vector<1x1x32xf32>
    %18 = vector.broadcast %17 : vector<1x1x32xf32> to vector<2x8x32xf32>
    %19 = arith.mulf %16, %18 : vector<2x8x32xf32>
    %cst_10 = arith.constant dense<0.000000e+00> : vector<2x8xf32>
    %20 = vector.multi_reduction <add>, %19, %cst_10 [2] : vector<2x8x32xf32> to vector<2x8xf32>
    %cst_11 = arith.constant dense<0xFF800000> : vector<2xf32>
    %21 = vector.multi_reduction <maximumf>, %20, %cst_11 [1] : vector<2x8xf32> to vector<2xf32>
    %22 = vector.shape_cast %21 : vector<2xf32> to vector<2x1xf32>
    %23 = vector.broadcast %22 : vector<2x1xf32> to vector<2x8xf32>
    %24 = arith.subf %20, %23 : vector<2x8xf32>
    %25 = math.exp %24 : vector<2x8xf32>
    %cst_12 = arith.constant dense<0.000000e+00> : vector<2xf32>
    %26 = vector.multi_reduction <add>, %25, %cst_12 [1] : vector<2x8xf32> to vector<2xf32>
    %27 = vector.shape_cast %26 : vector<2xf32> to vector<2x1xf32>
    %28 = vector.broadcast %27 : vector<2x1xf32> to vector<2x8xf32>
    %29 = arith.divf %25, %28 : vector<2x8xf32>
    %30 = vector.shape_cast %29 : vector<2x8xf32> to vector<2x8x1xf32>
    %31 = vector.broadcast %30 : vector<2x8x1xf32> to vector<2x8x64xf32>
    %32 = arith.mulf %31, %4 : vector<2x8x64xf32>
    %cst_13 = arith.constant dense<0.000000e+00> : vector<2x64xf32>
    %33 = vector.multi_reduction <add>, %32, %cst_13 [1] : vector<2x8x64xf32> to vector<2x64xf32>
    %34 = vector.shape_cast %33 : vector<2x64xf32> to vector<2x1x64xf32>
    %c0_14 = arith.constant 0 : index
    %c0_15 = arith.constant 0 : index
    %c0_16 = arith.constant 0 : index
    %35 = vector.load %arg4[%c0_14, %c0_15, %c0_16] : memref<2x1x72xf32, #tpu.memory_space<vmem>>, vector<2x1x64xf32>
    tpu.vector_store %arg4[%c0_14, %c0_15, %c0_16], %34 {strides = array<i32>} : memref<2x1x72xf32, #tpu.memory_space<vmem>>, vector<2x1x64xf32>,
    %36 = vector.shape_cast %29 : vector<2x8xf32> to vector<2x1x8xf32>
    %c0_17 = arith.constant 0 : index
    %c0_18 = arith.constant 0 : index
    %c64 = arith.constant 64 : index
    %37 = vector.load %arg4[%c0_17, %c0_18, %c64] : memref<2x1x72xf32, #tpu.memory_space<vmem>>, vector<2x1x8xf32>
    tpu.vector_store %arg4[%c0_17, %c0_18, %c64], %36 {strides = array<i32>} : memref<2x1x72xf32, #tpu.memory_space<vmem>>, vector<2x1x8xf32>,
    return
  }
  func.func @transform_0(%arg0: i32) -> (i32, i32) {
    %c0_i32 = arith.constant 0 : i32
    %c0_i32_0 = arith.constant 0 : i32
    %c0_i32_1 = arith.constant 0 : i32
    return %c0_i32, %c0_i32_0 : i32, i32
  }
  func.func @transform_1(%arg0: i32) -> (i32, i32, i32) {
    %c0_i32 = arith.constant 0 : i32
    %c0_i32_0 = arith.constant 0 : i32
    %c0_i32_1 = arith.constant 0 : i32
    %c0_i32_2 = arith.constant 0 : i32
    return %c0_i32, %c0_i32_0, %c0_i32_1 : i32, i32, i32
  }
  func.func @transform_2(%arg0: i32) -> (i32, i32) {
    %c0_i32 = arith.constant 0 : i32
    %c0_i32_0 = arith.constant 0 : i32
    %c0_i32_1 = arith.constant 0 : i32
    return %c0_i32, %c0_i32_0 : i32, i32
  }
  func.func @transform_3(%arg0: i32) -> (i32, i32, i32) {
    %c0_i32 = arith.constant 0 : i32
    %c0_i32_0 = arith.constant 0 : i32
    %c0_i32_1 = arith.constant 0 : i32
    %c0_i32_2 = arith.constant 0 : i32
    return %c0_i32, %c0_i32_0, %c0_i32_1 : i32, i32, i32
  }
}

</mosaic_0001>

<bundles_post_ra>
// kernel: attention_network.1
= control target key start
LH: loop header
LB: loop body
LE: loop exit
PB: predicated region body
PF: predicated region fallthrough
CT: control target
= control target key end

     0   :  { %vm61_vm0 = vcmask 261120   ;;  %vm30_vm1 = vcmask 523264   ;;  %v109_v34 = vlaneseq  ;;  %vm113_vm2 = vcmask 1041409   ;;  %s361_s2 = inlined_call_operand.vmem [shape: f32[98,32], index: 2, kind: input, shape index: {}]   ;;  %s362_s0 = inlined_call_operand.vmem [shape: f32[2,32], index: 0, kind: input, shape index: {}]   ;;  %s363_s1 = inlined_call_operand.vmem [shape: f32[2,8,64], index: 1, kind: input, shape index: {}]   ;;  %s364_s3 = inlined_call_operand.vmem [shape: f32[2,1,72], index: 3, kind: output, shape index: {}]  }
   0x1   :  { %v25_v0 = vld [vmem:[%s361_s2 + $0x58] sm:$0xff]  ;;  %v24_v1 = vld [vmem:[%s361_s2 + $0x50] sm:$0xff]  ;;  %v23_v3 = vld [vmem:[%s361_s2 + $0x48] sm:$0xff]  ;;  %vm116_vm3 = vcmask 58368   ;;  %v251_v41 = vmov 0   ;;  %vm207_vm12 = vcmask 516096  }
   0x2   :  { %45 = vmatpush.msra.mxu0 %v25_v0  ;;  %225 = vmatpush.msra.mxu2 %v25_v0  ;;  %v17_v2 = vld [vmem:[%s361_s2 + $0x18] sm:$0xff]  ;;  %v16_v4 = vld [vmem:[%s361_s2 + $0x10] sm:$0xff]  ;;  %v15_v5 = vld [vmem:[%s361_s2 + $0x8] sm:$0xff]  ;;  %v334_v35 = vand.u32 127, %v109_v34  ;;  %vm215_vm13 = vcmask 582144  }
   0x3   :  { %77 = vmatpush.msra.mxu1 %v17_v2  ;;  %v22_v6 = vld [vmem:[%s361_s2 + $0x40] sm:$0xff]  ;;  %v21_v8 = vld [vmem:[%s361_s2 + $0x38] sm:$0xff]  ;;  %v20_v10 = vld [vmem:[%s361_s2 + $0x30] sm:$0xff]  ;;  %235 = vset.pattern.permute.xlu2 %v251_v41 }
   0x4   :  { %46 = vmatpush.msra.mxu0 %v24_v1  ;;  %226 = vmatpush.msra.mxu2 %v24_v1  ;;  %v14_v7 = vld [vmem:[%s361_s2] sm:$0xff]  ;;  %v19_v11 = vld [vmem:[%s361_s2 + $0x28] sm:$0xff]  ;;  %v210_v34 = vadd.s32 4294967232, %v334_v35 }
   0x5   :  { %78 = vmatpush.msra.mxu1 %v16_v4  ;;  %v60_v9 = vld [vmem:[%s362_s0] sm:$0x3]  ;;  %v320_v14 = vld [vmem:[%s363_s1 + $0x8] sm:$0xff]  ;;  %234 = vset.pattern.permute.xlu1 %v251_v41 }
   0x6   :  { %47 = vmatpush.msra.mxu0 %v23_v3  ;;  %227 = vmatpush.msra.mxu2 %v23_v3  ;;  %v18_v12 = vld [vmem:[%s361_s2 + $0x20] sm:$0xff] }
   0x7   :  { %79 = vmatpush.msra.mxu1 %v15_v5  ;;  %v315_v13 = vld [vmem:[%s363_s1] sm:$0xff]  ;;  %236 = vset.pattern.permute.xlu0 %v251_v41 }
   0x8   :  { %48 = vmatpush.msra.mxu0 %v22_v6  ;;  %228 = vmatpush.msra.mxu2 %v22_v6  ;;  %v237_v17 = vld [vmem:[%s361_s2 + $0x60] ss:$0 sm:$0xff]  ;;  %v238_v25 = vld [vmem:[%s361_s2 + $0x61] ss:$0 sm:$0xff] }
   0x9   :  { %80 = vmatpush.msra.mxu1 %v14_v7 }
   0xa   :  { %49 = vmatpush.msra.mxu0 %v21_v8  ;;  %229 = vmatpush.msra.mxu2 %v21_v8 }
   0xb   :  { %224 = vmatmul.msk.f32.vlgmr.msra.gmra.mxu1 %vm61_vm0, %v60_v9 }
   0xc   :  { %50 = vmatpush.msra.mxu0 %v20_v10  ;;  %230 = vmatpush.msra.mxu2 %v20_v10 }
   0xe   :  { %51 = vmatpush.msra.mxu0 %v19_v11  ;;  %231 = vmatpush.msra.mxu2 %v19_v11 }
  0x10   :  { %52 = vmatpush.msra.mxu0 %v18_v12  ;;  %232 = vmatpush.msra.mxu2 %v18_v12 }
  0x11   :  { %222 = vmatmul.msk.f32.vlgmr.msra.gmra.mxu0 %vm30_vm1, %v315_v13  ;;  %223 = vmatmul.msk.f32.vlgmr.msra.gmra.mxu2 %vm30_vm1, %v320_v14 }
  0x88   :  { %v82_v15 = vpop.f32.mrf.mxu1 }
  0x89   :  { %v87_v16 = vperm.slane %v82_v15, 0  ;;  %v86_v19 = vrot.slane %v82_v15, 1 }
  0x8b   :  { %v88_v22 = vperm.slane %v86_v19, 0 }
  0x8e   :  { %v54_v18 = vpop.f32.mrf.mxu0 }
  0x8f   :  { %v91_v20 = vadd.f32 %v87_v16, %v54_v18 }
  0x91   :  { %v94_v21 = vadd.f32 %v237_v17, %v91_v20 }
  0x93   :  { %239 = vtanh.f32 %v94_v21 }
  0x94   :  { %v57_v23 = vpop.f32.mrf.mxu2 }
  0x95   :  { %v92_v24 = vadd.f32 %v88_v22, %v57_v23 }
  0x97   :  { %v95_v26 = vadd.f32 %v237_v17, %v92_v24 }
  0x99   :  { %v240_v27 = vpop.eup %239  ;;  %241 = vtanh.f32 %v95_v26 }
  0x9a   :  { %v99_v28 = vmul.f32 %v240_v27, %v238_v25 }
  0x9c   :  { %v101_v29 = vsel %vm61_vm0, %v99_v28, 0.0 }
  0x9d   :  { %102 = vadd.xlane.f32.xlu0 %v101_v29 }
  0x9f   :  { %v242_v30 = vpop.eup %241 }
  0xa0   :  { %v100_v31 = vmul.f32 %v242_v30, %v238_v25 }
  0xa2   :  { %v104_v32 = vsel %vm61_vm0, %v100_v31, 0.0 }
  0xa5   :  { %105 = vadd.xlane.f32.xlu0 %v104_v32 }
 0x110   :  { %v103_v33 = vpop.xlane.xlu0 %102 }
 0x111   :  { %v111_v37 = vperm.slane %v103_v33, %v334_v35 }
 0x118   :  { %v106_v36 = vpop.xlane.xlu0 %105 }
 0x119   :  { %v112_v38 = vperm.slane %v106_v36, %v334_v35 }
 0x11b   :  { %v114_v39 = vsel %vm113_vm2, %v112_v38, %v111_v37 }
 0x11c   :  { %v117_v40 = vsel %vm116_vm3, %v114_v39, -inf }
 0x11d   :  { %118 = vmax.xlane.f32.xlu1 %v117_v40 }
 0x190   :  { %v119_v42 = vpop.xlane.xlu1 %118 }
 0x191   :  { %v121_v43 = vperm.slane %v119_v42, 0  ;;  %v122_v44 = vperm.slane %v119_v42, 1 }
 0x193   :  { %v125_v45 = vsub.f32 %v103_v33, %v121_v43  ;;  %v126_v46 = vsub.f32 %v106_v36, %v122_v44 }
 0x195   :  { %v127_v47 = vmul.f32 1.442695, %v125_v45  ;;  %v129_v48 = vmul.f32 1.442695, %v126_v46 }
 0x197   :  { %243 = vpow2.f32 %v127_v47 }
 0x198   :  { %245 = vpow2.f32 %v129_v48 }
 0x19d   :  { %v244_v49 = vpop.eup %243 }
 0x19e   :  { %v246_v50 = vpop.eup %245  ;;  %134 = vperm.xlu1 %234, %v244_v49  }
 0x19f   :  { %137 = vperm.xlu2 %235, %v246_v50  }
 0x1f9   :  { %v138_v51 = vpop.permute.xlu2 %137 }
 0x1fa   :  { %v140_v53 = vperm.slane %v138_v51, %v334_v35 }
 0x210   :  { %v135_v52 = vpop.permute.xlu1 %134 }
 0x211   :  { %v139_v54 = vperm.slane %v135_v52, %v334_v35 }
 0x213   :  { %v141_v55 = vsel %vm113_vm2, %v140_v53, %v139_v54 }
 0x214   :  { %v143_v56 = vsel %vm116_vm3, %v141_v55, 0.0 }
 0x215   :  { %144 = vadd.xlane.f32.xlu2 %v143_v56 }
 0x288   :  { %v145_v57 = vpop.xlane.xlu2 %144 }
 0x289   :  { %v147_v58 = vperm.slane %v145_v57, 0  ;;  %v148_v59 = vperm.slane %v145_v57, 1 }
 0x28b   :  { %247 = vrcp.f32 %v147_v58  ;;  %v162_v2 = vand.u32 2147483648, %v147_v58  ;;  %v177_v3 = vand.u32 2147483648, %v148_v59  ;;  %v160_v5 = vand.u32 2147483647, %v147_v58 }
 0x28c   :  { %249 = vrcp.f32 %v148_v59  ;;  %v175_v7 = vand.u32 2147483647, %v148_v59  ;;  %vm156_vm6 = vweird.f32 %v147_v58  ;;  %vm171_vm7 = vweird.f32 %v148_v59 }
 0x28d   :  { %v163_v10 = vor.u32 1.1754944e-38, %v162_v2  ;;  %v178_v11 = vor.u32 1.1754944e-38, %v177_v3  ;;  %vm161_vm10 = vcmp.eq.f32.partialorder %v160_v5, 8.507059e+37 }
 0x28e   :  { %vm176_vm11 = vcmp.eq.f32.partialorder %v175_v7, 8.507059e+37 }
 0x291   :  { %v248_v60 = vpop.eup %247 }
 0x292   :  { %v250_v61 = vpop.eup %249  ;;  %v152_v62 = vmul.f32 %v248_v60, %v147_v58  ;;  %vm157_vm4 = vweird.f32 %v248_v60 }
 0x293   :  { %v167_v63 = vmul.f32 %v250_v61, %v148_v59  ;;  %vm172_vm5 = vweird.f32 %v250_v61  ;;  %vm158_vm8 = vmor %vm156_vm6, %vm157_vm4 }
 0x294   :  { %v153_v0 = vsub.f32 1.0, %v152_v62  ;;  %vm173_vm9 = vmor %vm171_vm7, %vm172_vm5 }
 0x295   :  { %v168_v1 = vsub.f32 1.0, %v167_v63 }
 0x296   :  { %v154_v4 = vmul.f32 %v248_v60, %v153_v0 }
 0x297   :  { %v169_v6 = vmul.f32 %v250_v61, %v168_v1 }
 0x298   :  { %v155_v8 = vadd.f32 %v248_v60, %v154_v4 }
 0x299   :  { %v170_v9 = vadd.f32 %v250_v61, %v169_v6 }
 0x29a   :  { %v159_v12 = vsel %vm158_vm8, %v248_v60, %v155_v8 }
 0x29b   :  { %v174_v15 = vsel %vm173_vm9, %v250_v61, %v170_v9  ;;  %v164_v16 = vsel %vm161_vm10, %v163_v10, %v159_v12 }
 0x29c   :  { %v179_v17 = vsel %vm176_vm11, %v178_v11, %v174_v15  ;;  %v165_v18 = vmul.f32 %v244_v49, %v164_v16 }
 0x29d   :  { %v180_v19 = vmul.f32 %v246_v50, %v179_v17 }
 0x29e   :  { %183 = vperm.xlu0 %236, %v165_v18  }
 0x29f   :  { %188 = vperm.xlu1 %234, %v180_v19  }
 0x310   :  { %v184_v20 = vpop.permute.xlu0 %183 }
 0x311   :  { %v189_v21 = vpop.permute.xlu1 %188  ;;  %v191_v22 = vmul.f32 %v184_v20, %v315_v13  ;;  %v211_v39 = vperm.slane %v184_v20, %v210_v34 }
 0x312   :  { %v192_v23 = vmul.f32 %v189_v21, %v320_v14  ;;  %v212_v38 = vperm.slane %v189_v21, %v210_v34 }
 0x313   :  { %v193_v24 = vsel %vm30_vm1, %v191_v22, 0.0 }
 0x314   :  { %v200_v25 = vsel %vm30_vm1, %v192_v23, 0.0  ;;  %v194_v26 = vrot.slane %v193_v24, 4 }
 0x315   :  { %v201_v27 = vrot.slane %v200_v25, 4 }
 0x316   :  { %v195_v28 = vadd.f32 %v194_v26, %v193_v24 }
 0x317   :  { %v202_v29 = vadd.f32 %v201_v27, %v200_v25 }
 0x318   :  { %v196_v30 = vrot.slane %v195_v28, 2 }
 0x319   :  { %v203_v31 = vrot.slane %v202_v29, 2 }
 0x31a   :  { %v197_v32 = vadd.f32 %v196_v30, %v195_v28 }
 0x31b   :  { %v204_v33 = vadd.f32 %v203_v31, %v202_v29 }
 0x31c   :  { %v198_v36 = vrot.slane %v197_v32, 1 }
 0x31d   :  { %v205_v37 = vrot.slane %v204_v33, 1 }
 0x31e   :  { %v199_v13 = vadd.f32 %v198_v36, %v197_v32 }
 0x31f   :  { %v206_v14 = vadd.f32 %v205_v37, %v204_v33 }
 0x320   :  { %208 = vst.msk [vmem:[%s364_s3] sm:$0x1] %vm207_vm12, %v199_v13 }
 0x321   :  { %209 = vst.msk [vmem:[%s364_s3 + $0x1] sm:$0x1] %vm207_vm12, %v206_v14 }
 0x322   :  { %217 = vst.msk [vmem:[%s364_s3 + $0x1] sm:$0x1] %vm215_vm13, %v212_v38 }
 0x323   :  { %216 = vst.msk [vmem:[%s364_s3] sm:$0x1] %vm215_vm13, %v211_v39 }

</bundles_post_ra>
